<compile_context>
chip_gen: v5e
topology: v5e:2x2
jax: 0.10.0
libtpu: 0.0.40
codegen_flags: <defaults>
</compile_context>

<pallas_src>
import functools

import jax
import jax.numpy as jnp
from jax.experimental import pallas as pl
from jax.experimental.pallas import tpu as pltpu


def _softplus(x):
    # Stable softplus: max(x, 0) + log(1 + exp(-|x|)); exp argument is <= 0,
    # so it never overflows (matches PyTorch F.softplus behavior).
    return jnp.maximum(x, 0.0) + jnp.log(1.0 + jnp.exp(-jnp.abs(x)))


def _ucb_nfc_kernel(x_ref, w_ref, b_ref, out_ref, *, coefs, num_samples,
                    var_off, noise_off):
    """One lane-dense tile of the acquisition.

    x_ref   : [D, TN]  pre-transposed tile of test points (N on lanes)
    w_ref   : [M, D]   stacked heads: [mu_mean (pad 8) | var (pad 8) | noise (pad 8)]
    b_ref   : [M, 1]   matching stacked biases
    out_ref : [F, TN]  acquisition value per fidelity / test point
    coefs   : static tuple, coefs[f] = beta / costs[f]
    """
    # Single fused MXU pass for all heads against this tile of x.
    pre = jnp.dot(w_ref[...], x_ref[...],
                  preferred_element_type=jnp.float32) + b_ref[...]      # [M, TN]

    mean_mu = pre[0:1, :]                      # [1, TN] (linear head; S-mean folded)
    var = _softplus(pre[var_off:var_off + num_samples, :])              # [S, TN]
    inv_s = jnp.float32(1.0 / num_samples)

    for f, coef in enumerate(coefs):           # static, tiny F -> unrolled
        noise_f = _softplus(pre[noise_off + f:noise_off + f + 1, :])    # [1, TN]
        # mean over S of sqrt(var + noise_f); noise is x-dependent only.
        g = jnp.sum(jnp.sqrt(var + noise_f), axis=0, keepdims=True) * inv_s
        out_ref[pl.ds(f, 1), :] = mean_mu + jnp.float32(coef) * g       # [1, TN]


def _pad_rows(w, b, mult=8):
    """Zero-pad a [R, D] weight / [R] bias block to a multiple of `mult` rows."""
    r, d = w.shape
    rp = ((r + mult - 1) // mult) * mult
    wp = jnp.zeros((rp, d), w.dtype).at[:r].set(w)
    bp = jnp.zeros((rp,), b.dtype).at[:r].set(b)
    return wp, bp, rp


def ucb_our_nfc_pallas(test_x, w_mu, b_mu, w_var, b_var, w_noise, b_noise,
                       *, beta, costs):
    n, d = test_x.shape
    s = w_mu.shape[0]
    f = w_noise.shape[0]
    coefs = tuple(float(beta) / float(c) for c in costs)

    # mean_S(mus + c*sqrt(...)) = mean_S(mus) + c*mean_S(sqrt(...)); mus is
    # linear in x, so fold its S-mean into a single [1, D] weight row.
    w_mu_mean = jnp.mean(w_mu, axis=0, keepdims=True)        # [1, D]
    b_mu_mean = jnp.mean(b_mu, keepdims=True)                # [1]

    # Stack all heads into one weight matrix; each block padded to a multiple
    # of 8 rows so in-kernel row slices stay sublane-aligned.
    wm, bm, mu_rows = _pad_rows(w_mu_mean, b_mu_mean)
    wv, bv, var_rows = _pad_rows(w_var, b_var)
    wn, bn, _ = _pad_rows(w_noise, b_noise)
    w_all = jnp.concatenate([wm, wv, wn], axis=0)            # [M, D]
    b_all = jnp.concatenate([bm, bv, bn], axis=0)[:, None]   # [M, 1]
    m = w_all.shape[0]
    var_off = mu_rows
    noise_off = mu_rows + var_rows

    # Lane-dense layout: pre-transpose x to [D, N] (one-time XLA transpose)
    # and pad N up to a multiple of the lane tile TN (multiple of 128).
    tn = min(512, ((n + 127) // 128) * 128)
    n_pad = pl.cdiv(n, tn) * tn
    x_t = jnp.zeros((d, n_pad), jnp.float32).at[:, :n].set(test_x.T)

    kernel = functools.partial(_ucb_nfc_kernel, coefs=coefs, num_samples=s,
                               var_off=var_off, noise_off=noise_off)

    out = pl.pallas_call(
        kernel,
        out_shape=jax.ShapeDtypeStruct((f, n_pad), jnp.float32),
        grid_spec=pltpu.PrefetchScalarGridSpec(
            num_scalar_prefetch=0,
            grid=(n_pad // tn,),  # tile the test-point axis; pipelined x DMA
            in_specs=[
                pl.BlockSpec((d, tn), lambda i: (0, i)),     # x tile (lane-dense)
                pl.BlockSpec((m, d), lambda i: (0, 0)),      # stacked weights (resident)
                pl.BlockSpec((m, 1), lambda i: (0, 0)),      # stacked biases  (resident)
            ],
            out_specs=pl.BlockSpec((f, tn), lambda i: (0, i)),
        ),
        compiler_params=pltpu.CompilerParams(
            dimension_semantics=("parallel",)),              # megacore over N tiles
    )(x_t, w_all, b_all)
    return out[:, :n]


def ucb_our_nfc_reference(test_x, w_mu, b_mu, w_var, b_var, w_noise, b_noise,
                          *, beta, costs):
    """Pure-JAX mirror of the PyTorch forward (repeat / sqrt / mean / cat)."""
    s = w_mu.shape[0]
    n, d = test_x.shape
    ex = jnp.broadcast_to(test_x[None], (s, n, d))           # unsqueeze(0).repeat
    mus = jnp.einsum("snd,sd->sn", ex, w_mu) + b_mu[:, None]
    vars_ = _softplus(jnp.einsum("snd,sd->sn", ex, w_var) + b_var[:, None])
    res = []
    for i in range(w_noise.shape[0]):
        noise_var = _softplus(
            jnp.einsum("snd,d->sn", ex, w_noise[i]) + b_noise[i])
        r = mus + beta * (1.0 / costs[i]) * jnp.sqrt(vars_ + noise_var)
        res.append(jnp.mean(r, axis=0)[None])                # mean over samples
    return jnp.concatenate(res, axis=0)                      # [num_f, N]


if __name__ == "__main__":
    # Small, module-consistent shapes.
    N, D = 16, 8          # test_x: [N, D]
    S = 16                # model.num_samples
    F = 3                 # likelihood.noise_model.num_f
    BETA = 2.0
    COSTS = (1.0, 2.0, 4.0)

    key = jax.random.PRNGKey(0)
    ks = jax.random.split(key, 7)
    test_x = jax.random.normal(ks[0], (N, D), dtype=jnp.float32)
    w_mu = 0.5 * jax.random.normal(ks[1], (S, D), dtype=jnp.float32)
    b_mu = 0.1 * jax.random.normal(ks[2], (S,), dtype=jnp.float32)
    w_var = 0.5 * jax.random.normal(ks[3], (S, D), dtype=jnp.float32)
    b_var = 0.1 * jax.random.normal(ks[4], (S,), dtype=jnp.float32)
    w_noise = 0.5 * jax.random.normal(ks[5], (F, D), dtype=jnp.float32)
    b_noise = 0.1 * jax.random.normal(ks[6], (F,), dtype=jnp.float32)

    # TODO(synk): the abstract GP model / noise_model have no Pallas
    # equivalent; they are synthesized as deterministic linear+softplus heads.
    out = ucb_our_nfc_pallas(test_x, w_mu, b_mu, w_var, b_var,
                             w_noise, b_noise, beta=BETA, costs=COSTS)
    out = jax.block_until_ready(out)

    ref = ucb_our_nfc_reference(test_x, w_mu, b_mu, w_var, b_var,
                                w_noise, b_noise, beta=BETA, costs=COSTS)
    ref = jax.block_until_ready(ref)

    assert out.shape == (F, N), out.shape
    assert jnp.allclose(out, ref, rtol=1e-4, atol=1e-4), (out, ref)
    print("KERNEL_OK")
</pallas_src>

<mosaic_0001>
module attributes {stable_mosaic.version = 11 : i64} {
  func.func @_ucb_nfc_kernel(%arg0: i32, %arg1: memref<8x128xf32, #tpu.memory_space<vmem>>, %arg2: memref<32x8xf32, #tpu.memory_space<vmem>>, %arg3: memref<32x1xf32, #tpu.memory_space<vmem>>, %arg4: memref<3x128xf32, #tpu.memory_space<vmem>>) attributes {dimension_semantics = [#tpu.dimension_semantics<parallel>], iteration_bounds = array<i64: 1>, scalar_prefetch = 0 : i64, scratch_operands = 0 : i64, tpu.core_type = #tpu.core_type<tc>, window_params = [{transform_indices = @transform_0, window_bounds = array<i64: 8, 128>}, {pipeline_mode = #tpu.pipeline_mode<synchronous>, transform_indices = @transform_1, window_bounds = array<i64: 32, 8>}, {pipeline_mode = #tpu.pipeline_mode<synchronous>, transform_indices = @transform_2, window_bounds = array<i64: 32, 1>}, {transform_indices = @transform_3, window_bounds = array<i64: 3, 128>}]} {
    %c0 = arith.constant 0 : index
    %c0_0 = arith.constant 0 : index
    %0 = vector.load %arg2[%c0, %c0_0] : memref<32x8xf32, #tpu.memory_space<vmem>>, vector<32x8xf32>
    %c0_1 = arith.constant 0 : index
    %c0_2 = arith.constant 0 : index
    %1 = vector.load %arg1[%c0_1, %c0_2] : memref<8x128xf32, #tpu.memory_space<vmem>>, vector<8x128xf32>
    %cst = arith.constant dense<0.000000e+00> : vector<32x128xf32>
    %2 = tpu.matmul %0, %1, %cst {dimension_numbers = #tpu.dot_dimension_numbers<[1], [0], [0], [1], [0, 0, 1, 1], [], []>} : vector<32x8xf32>, vector<8x128xf32>, vector<32x128xf32> -> vector<32x128xf32>
    %c0_3 = arith.constant 0 : index
    %c0_4 = arith.constant 0 : index
    %3 = vector.load %arg3[%c0_3, %c0_4] : memref<32x1xf32, #tpu.memory_space<vmem>>, vector<32x1xf32>
    %4 = vector.broadcast %3 : vector<32x1xf32> to vector<32x128xf32>
    %5 = arith.addf %2, %4 : vector<32x128xf32>
    %6 = vector.extract_strided_slice %5 {offsets = [0, 0], sizes = [1, 128], strides = [1, 1]} : vector<32x128xf32> to vector<1x128xf32>
    %7 = vector.extract_strided_slice %5 {offsets = [8, 0], sizes = [16, 128], strides = [1, 1]} : vector<32x128xf32> to vector<16x128xf32>
    %cst_5 = arith.constant 0.000000e+00 : f32
    %8 = vector.broadcast %cst_5 : f32 to vector<16x128xf32>
    %9 = arith.maximumf %7, %8 : vector<16x128xf32>
    %10 = math.absf %7 : vector<16x128xf32>
    %cst_6 = arith.constant 0.000000e+00 : f32
    %11 = vector.broadcast %cst_6 : f32 to vector<16x128xf32>
    %12 = arith.subf %11, %10 : vector<16x128xf32>
    %13 = math.exp %12 : vector<16x128xf32>
    %cst_7 = arith.constant 1.000000e+00 : f32
    %14 = vector.broadcast %cst_7 : f32 to vector<16x128xf32>
    %15 = arith.addf %14, %13 : vector<16x128xf32>
    %16 = math.log %15 : vector<16x128xf32>
    %17 = arith.addf %9, %16 : vector<16x128xf32>
    %18 = vector.extract_strided_slice %5 {offsets = [24, 0], sizes = [1, 128], strides = [1, 1]} : vector<32x128xf32> to vector<1x128xf32>
    %cst_8 = arith.constant 0.000000e+00 : f32
    %19 = vector.broadcast %cst_8 : f32 to vector<1x128xf32>
    %20 = arith.maximumf %18, %19 : vector<1x128xf32>
    %21 = math.absf %18 : vector<1x128xf32>
    %cst_9 = arith.constant 0.000000e+00 : f32
    %22 = vector.broadcast %cst_9 : f32 to vector<1x128xf32>
    %23 = arith.subf %22, %21 : vector<1x128xf32>
    %24 = math.exp %23 : vector<1x128xf32>
    %cst_10 = arith.constant 1.000000e+00 : f32
    %25 = vector.broadcast %cst_10 : f32 to vector<1x128xf32>
    %26 = arith.addf %25, %24 : vector<1x128xf32>
    %27 = math.log %26 : vector<1x128xf32>
    %28 = arith.addf %20, %27 : vector<1x128xf32>
    %29 = vector.broadcast %28 : vector<1x128xf32> to vector<16x128xf32>
    %30 = arith.addf %17, %29 : vector<16x128xf32>
    %31 = math.sqrt %30 : vector<16x128xf32>
    %cst_11 = arith.constant dense<0.000000e+00> : vector<128xf32>
    %32 = vector.multi_reduction <add>, %31, %cst_11 [0] : vector<16x128xf32> to vector<128xf32>
    %33 = vector.shape_cast %32 : vector<128xf32> to vector<1x128xf32>
    %cst_12 = arith.constant 6.250000e-02 : f32
    %34 = vector.broadcast %cst_12 : f32 to vector<1x128xf32>
    %35 = arith.mulf %33, %34 : vector<1x128xf32>
    %cst_13 = arith.constant 2.000000e+00 : f32
    %36 = vector.broadcast %cst_13 : f32 to vector<1x128xf32>
    %37 = arith.mulf %36, %35 : vector<1x128xf32>
    %38 = arith.addf %6, %37 : vector<1x128xf32>
    %c0_14 = arith.constant 0 : index
    %c0_15 = arith.constant 0 : index
    %39 = vector.load %arg4[%c0_14, %c0_15] : memref<3x128xf32, #tpu.memory_space<vmem>>, vector<1x128xf32>
    tpu.vector_store %arg4[%c0_14, %c0_15], %38 {strides = array<i32>} : memref<3x128xf32, #tpu.memory_space<vmem>>, vector<1x128xf32>,
    %40 = vector.extract_strided_slice %5 {offsets = [25, 0], sizes = [1, 128], strides = [1, 1]} : vector<32x128xf32> to vector<1x128xf32>
    %cst_16 = arith.constant 0.000000e+00 : f32
    %41 = vector.broadcast %cst_16 : f32 to vector<1x128xf32>
    %42 = arith.maximumf %40, %41 : vector<1x128xf32>
    %43 = math.absf %40 : vector<1x128xf32>
    %cst_17 = arith.constant 0.000000e+00 : f32
    %44 = vector.broadcast %cst_17 : f32 to vector<1x128xf32>
    %45 = arith.subf %44, %43 : vector<1x128xf32>
    %46 = math.exp %45 : vector<1x128xf32>
    %cst_18 = arith.constant 1.000000e+00 : f32
    %47 = vector.broadcast %cst_18 : f32 to vector<1x128xf32>
    %48 = arith.addf %47, %46 : vector<1x128xf32>
    %49 = math.log %48 : vector<1x128xf32>
    %50 = arith.addf %42, %49 : vector<1x128xf32>
    %51 = vector.broadcast %50 : vector<1x128xf32> to vector<16x128xf32>
    %52 = arith.addf %17, %51 : vector<16x128xf32>
    %53 = math.sqrt %52 : vector<16x128xf32>
    %cst_19 = arith.constant dense<0.000000e+00> : vector<128xf32>
    %54 = vector.multi_reduction <add>, %53, %cst_19 [0] : vector<16x128xf32> to vector<128xf32>
    %55 = vector.shape_cast %54 : vector<128xf32> to vector<1x128xf32>
    %cst_20 = arith.constant 6.250000e-02 : f32
    %56 = vector.broadcast %cst_20 : f32 to vector<1x128xf32>
    %57 = arith.mulf %55, %56 : vector<1x128xf32>
    %cst_21 = arith.constant 1.000000e+00 : f32
    %58 = vector.broadcast %cst_21 : f32 to vector<1x128xf32>
    %59 = arith.mulf %58, %57 : vector<1x128xf32>
    %60 = arith.addf %6, %59 : vector<1x128xf32>
    %c1 = arith.constant 1 : index
    %c0_22 = arith.constant 0 : index
    %61 = vector.load %arg4[%c1, %c0_22] : memref<3x128xf32, #tpu.memory_space<vmem>>, vector<1x128xf32>
    tpu.vector_store %arg4[%c1, %c0_22], %60 {strides = array<i32>} : memref<3x128xf32, #tpu.memory_space<vmem>>, vector<1x128xf32>,
    %62 = vector.extract_strided_slice %5 {offsets = [26, 0], sizes = [1, 128], strides = [1, 1]} : vector<32x128xf32> to vector<1x128xf32>
    %cst_23 = arith.constant 0.000000e+00 : f32
    %63 = vector.broadcast %cst_23 : f32 to vector<1x128xf32>
    %64 = arith.maximumf %62, %63 : vector<1x128xf32>
    %65 = math.absf %62 : vector<1x128xf32>
    %cst_24 = arith.constant 0.000000e+00 : f32
    %66 = vector.broadcast %cst_24 : f32 to vector<1x128xf32>
    %67 = arith.subf %66, %65 : vector<1x128xf32>
    %68 = math.exp %67 : vector<1x128xf32>
    %cst_25 = arith.constant 1.000000e+00 : f32
    %69 = vector.broadcast %cst_25 : f32 to vector<1x128xf32>
    %70 = arith.addf %69, %68 : vector<1x128xf32>
    %71 = math.log %70 : vector<1x128xf32>
    %72 = arith.addf %64, %71 : vector<1x128xf32>
    %73 = vector.broadcast %72 : vector<1x128xf32> to vector<16x128xf32>
    %74 = arith.addf %17, %73 : vector<16x128xf32>
    %75 = math.sqrt %74 : vector<16x128xf32>
    %cst_26 = arith.constant dense<0.000000e+00> : vector<128xf32>
    %76 = vector.multi_reduction <add>, %75, %cst_26 [0] : vector<16x128xf32> to vector<128xf32>
    %77 = vector.shape_cast %76 : vector<128xf32> to vector<1x128xf32>
    %cst_27 = arith.constant 6.250000e-02 : f32
    %78 = vector.broadcast %cst_27 : f32 to vector<1x128xf32>
    %79 = arith.mulf %77, %78 : vector<1x128xf32>
    %cst_28 = arith.constant 5.000000e-01 : f32
    %80 = vector.broadcast %cst_28 : f32 to vector<1x128xf32>
    %81 = arith.mulf %80, %79 : vector<1x128xf32>
    %82 = arith.addf %6, %81 : vector<1x128xf32>
    %c2 = arith.constant 2 : index
    %c0_29 = arith.constant 0 : index
    %83 = vector.load %arg4[%c2, %c0_29] : memref<3x128xf32, #tpu.memory_space<vmem>>, vector<1x128xf32>
    tpu.vector_store %arg4[%c2, %c0_29], %82 {strides = array<i32>} : memref<3x128xf32, #tpu.memory_space<vmem>>, vector<1x128xf32>,
    return
  }
  func.func @transform_0(%arg0: i32) -> (i32, i32) {
    %c0_i32 = arith.constant 0 : i32
    %c0_i32_0 = arith.constant 0 : i32
    return %c0_i32, %arg0 : i32, i32
  }
  func.func @transform_1(%arg0: i32) -> (i32, i32) {
    %c0_i32 = arith.constant 0 : i32
    %c0_i32_0 = arith.constant 0 : i32
    %c0_i32_1 = arith.constant 0 : i32
    return %c0_i32, %c0_i32_0 : i32, i32
  }
  func.func @transform_2(%arg0: i32) -> (i32, i32) {
    %c0_i32 = arith.constant 0 : i32
    %c0_i32_0 = arith.constant 0 : i32
    %c0_i32_1 = arith.constant 0 : i32
    return %c0_i32, %c0_i32_0 : i32, i32
  }
  func.func @transform_3(%arg0: i32) -> (i32, i32) {
    %c0_i32 = arith.constant 0 : i32
    %c0_i32_0 = arith.constant 0 : i32
    return %c0_i32, %arg0 : i32, i32
  }
}

</mosaic_0001>

<bundles_post_ra>
// kernel: tpu_custom_call.1
= control target key start
LH: loop header
LB: loop body
LE: loop exit
PB: predicated region body
PF: predicated region fallthrough
CT: control target
= control target key end

     0   :  { %vm44_vm0 = vcmask 64512   ;;  %s433_s0 = inlined_call_operand.vmem [shape: f32[8,128], index: 0, kind: input, shape index: {}]   ;;  %s434_s1 = inlined_call_operand.vmem [shape: f32[32,8], index: 1, kind: input, shape index: {}]   ;;  %s435_s2 = inlined_call_operand.vmem [shape: f32[32,1], index: 2, kind: input, shape index: {}]   ;;  %s436_s3 = inlined_call_operand.hbm [shape: f32[3,128], index: 3, kind: output, shape index: {}]  }
   0x1   :  { %v19_v0 = vld [vmem:[%s433_s0] sm:$0xff]  ;;  %v16_v1 = vld [vmem:[%s434_s1 + $0x8] sm:$0xff]  ;;  %v17_v2 = vld [vmem:[%s434_s1 + $0x10] sm:$0xff] }
   0x2   :  { %246 = vmatpush.msra.mxu1 %v19_v0  ;;  %247 = vmatpush.msra.mxu2 %v19_v0  ;;  %v18_v3 = vld [vmem:[%s434_s1 + $0x18] sm:$0xff]  ;;  %v15_v5 = vld [vmem:[%s434_s1] sm:$0xff] }
   0x3   :  { %248 = vmatpush.msra.mxu3 %v19_v0  ;;  %243 = vmatmul.msk.f32.vlgmr.msra.gmra.mxu1 %vm44_vm0, %v16_v1  ;;  %v23_v4 = vld [vmem:[%s435_s2 + $0x18] sm:$0xff] }
   0x4   :  { %244 = vmatmul.msk.f32.vlgmr.msra.gmra.mxu2 %vm44_vm0, %v17_v2  ;;  %245 = vmatmul.msk.f32.vlgmr.msra.gmra.mxu3 %vm44_vm0, %v18_v3 }
   0x5   :  { %8 = vsyncpa [#allocation3], 0  ;;  %v303_v6 = vmov 0   ;;  %72 = vmatpush.msra.mxu0 %v19_v0  ;;  %v22_v7 = vld [vmem:[%s435_s2 + $0x10] sm:$0xff]  ;;  %v21_v8 = vld [vmem:[%s435_s2 + $0x8] sm:$0xff]  ;;  %s233_s4 = sshll.u32 %s436_s3, 4  ;;  %s234_s4 = int_to_ptr.hbm [resolvable:$true] %s233_s4 }
   0x6   :  { %251 = vset.pattern.permute.xlu0 %v303_v6  ;;  %242 = vmatmul.msk.f32.vlgmr.msra.gmra.mxu0 %vm44_vm0, %v15_v5  ;;  %v20_v9 = vld [vmem:[%s435_s2] sm:$0xff]  ;;  %s304_s2 = smov [#allocation2]  }
   0x7   :  { %41 = vperm.xlu0 %251, %v23_v4   ;;  %252 = vset.pattern.permute.xlu1 %v303_v6  ;;  %s231_s28 = sshll.u32 %s304_s2, 4  ;;  %s232_s28 = int_to_ptr.vmem [resolvable:$true] %s231_s28 }
   0x8   :  { %36 = vperm.xlu1 %252, %v22_v7  }
   0xf   :  { %31 = vperm.xlu0 %251, %v21_v8  }
  0x10   :  { %26 = vperm.xlu1 %252, %v20_v9  }
  0x79   :  { %v42_v10 = vpop.permute.xlu0 %41 }
  0x7a   :  { %v37_v16 = vpop.permute.xlu1 %36 }
  0x80   :  { %v77_v12 = vpop.f32.mrf.mxu1 }
  0x81   :  { %v32_v11 = vpop.permute.xlu0 %31 }
  0x82   :  { %v78_v13 = vadd.f32 %v77_v12, %v32_v11 }
  0x84   :  { %v88_v14 = vand.u32 2147483647, %v78_v13  ;;  %v86_v41 = vmax.f32 %v78_v13, 0.0 }
  0x86   :  { %v90_v15 = vsub.f32 0.0, %v88_v14 }
  0x87   :  { %v80_v18 = vpop.f32.mrf.mxu2  ;;  %v83_v19 = vpop.f32.mrf.mxu3 }
  0x88   :  { %v92_v17 = vmul.f32 1.442695, %v90_v15  ;;  %v81_v20 = vadd.f32 %v80_v18, %v37_v16  ;;  %v84_v21 = vadd.f32 %v83_v19, %v42_v10 }
  0x8a   :  { %253 = vpow2.f32 %v92_v17  ;;  %v89_v22 = vand.u32 2147483647, %v81_v20  ;;  %v105_v23 = vand.u32 2147483647, %v84_v21  ;;  %v104_v39 = vmax.f32 %v84_v21, 0.0 }
  0x8b   :  { %v87_v42 = vmax.f32 %v81_v20, 0.0 }
  0x8c   :  { %v91_v24 = vsub.f32 0.0, %v89_v22  ;;  %v106_v25 = vsub.f32 0.0, %v105_v23 }
  0x8e   :  { %v94_v26 = vmul.f32 1.442695, %v91_v24  ;;  %v107_v27 = vmul.f32 1.442695, %v106_v25 }
  0x90   :  { %v254_v28 = vpop.eup %253  ;;  %255 = vpow2.f32 %v94_v26 }
  0x91   :  { %257 = vpow2.f32 %v107_v27  ;;  %v96_v29 = vadd.f32 1.0, %v254_v28 }
  0x93   :  { %259 = vlog2.f32 %v96_v29 }
  0x96   :  { %v256_v30 = vpop.eup %255 }
  0x97   :  { %v258_v31 = vpop.eup %257  ;;  %v97_v32 = vadd.f32 1.0, %v256_v30 }
  0x98   :  { %v109_v33 = vadd.f32 1.0, %v258_v31 }
  0x99   :  { %261 = vlog2.f32 %v97_v32  ;;  %v260_v34 = vpop.eup %259 }
  0x9a   :  { %263 = vlog2.f32 %v109_v33  ;;  %v99_v37 = vmul.f32 0.6931472, %v260_v34 }
  0x9c   :  { %v102_v44 = vadd.f32 %v99_v37, %v86_v41 }
  0x9f   :  { %v262_v35 = vpop.eup %261 }
  0xa0   :  { %v264_v36 = vpop.eup %263  ;;  %v101_v38 = vmul.f32 0.6931472, %v262_v35 }
  0xa1   :  { %v111_v40 = vmul.f32 0.6931472, %v264_v36 }
  0xa2   :  { %v103_v45 = vadd.f32 %v101_v38, %v87_v42 }
  0xa3   :  { %v112_v43 = vadd.f32 %v111_v40, %v104_v39 }
  0xa5   :  { %v113_v46 = vperm.slane %v112_v43, 0  ;;  %v151_v47 = vperm.slane %v112_v43, 1  ;;  %v188_v48 = vperm.slane %v112_v43, 2 }
  0xa7   :  { %v356_v49 = vadd.f32 %v113_v46, %v102_v44  ;;  %v358_v50 = vadd.f32 %v113_v46, %v103_v45  ;;  %v360_v51 = vadd.f32 %v151_v47, %v102_v44  ;;  %v362_v52 = vadd.f32 %v151_v47, %v103_v45 }
  0xa8   :  { %v365_v53 = vadd.f32 %v188_v48, %v102_v44  ;;  %v368_v54 = vadd.f32 %v188_v48, %v103_v45 }
  0xa9   :  { %265 = vrsqrt.f32 %v356_v49  ;;  %vm123_vm1 = vcmp.eq.f32.partialorder %v356_v49, inf  ;;  %v126_v0 = vand.u32 2147483648, %v356_v49  ;;  %vm125_vm2 = vcmp.eq.f32.partialorder %v356_v49, 0.0 }
  0xaa   :  { %267 = vrsqrt.f32 %v358_v50  ;;  %vm135_vm3 = vcmp.eq.f32.partialorder %v358_v50, inf  ;;  %v138_v5 = vand.u32 2147483648, %v358_v50  ;;  %vm137_vm4 = vcmp.eq.f32.partialorder %v358_v50, 0.0 }
  0xab   :  { %269 = vrsqrt.f32 %v360_v51  ;;  %vm161_vm5 = vcmp.eq.f32.partialorder %v360_v51, inf  ;;  %vm163_vm6 = vcmp.eq.f32.partialorder %v360_v51, 0.0  ;;  %v164_v13 = vand.u32 2147483648, %v360_v51 }
  0xac   :  { %271 = vrsqrt.f32 %v362_v52  ;;  %vm173_vm7 = vcmp.eq.f32.partialorder %v362_v52, inf  ;;  %vm175_vm8 = vcmp.eq.f32.partialorder %v362_v52, 0.0  ;;  %v176_v23 = vand.u32 2147483648, %v362_v52 }
  0xad   :  { %273 = vrsqrt.f32 %v365_v53  ;;  %vm198_vm9 = vcmp.eq.f32.partialorder %v365_v53, inf  ;;  %vm200_vm10 = vcmp.eq.f32.partialorder %v365_v53, 0.0  ;;  %v201_v34 = vand.u32 2147483648, %v365_v53 }
  0xae   :  { %275 = vrsqrt.f32 %v368_v54  ;;  %vm210_vm11 = vcmp.eq.f32.partialorder %v368_v54, inf  ;;  %vm212_vm12 = vcmp.eq.f32.partialorder %v368_v54, 0.0  ;;  %v213_v48 = vand.u32 2147483648, %v368_v54 }
  0xaf   :  { %v266_v55 = vpop.eup %265 }
  0xb0   :  { %v268_v56 = vpop.eup %267  ;;  %v117_v57 = vmul.f32 %v266_v55, %v356_v49 }
  0xb1   :  { %v270_v58 = vpop.eup %269  ;;  %v129_v59 = vmul.f32 %v268_v56, %v358_v50 }
  0xb2   :  { %v272_v60 = vpop.eup %271  ;;  %v118_v61 = vmul.f32 %v266_v55, %v117_v57  ;;  %v155_v62 = vmul.f32 %v270_v58, %v360_v51 }
  0xb3   :  { %v274_v63 = vpop.eup %273  ;;  %v130_v1 = vmul.f32 %v268_v56, %v129_v59  ;;  %v167_v2 = vmul.f32 %v272_v60, %v362_v52 }
  0xb4   :  { %v276_v3 = vpop.eup %275  ;;  %v119_v4 = vmul.f32 0.5, %v118_v61  ;;  %v156_v6 = vmul.f32 %v270_v58, %v155_v62  ;;  %v192_v7 = vmul.f32 %v274_v63, %v365_v53 }
  0xb5   :  { %v131_v8 = vmul.f32 0.5, %v130_v1  ;;  %v168_v9 = vmul.f32 %v272_v60, %v167_v2  ;;  %v204_v10 = vmul.f32 %v276_v3, %v368_v54 }
  0xb6   :  { %v120_v11 = vsub.f32 1.5, %v119_v4  ;;  %v157_v12 = vmul.f32 0.5, %v156_v6  ;;  %v193_v14 = vmul.f32 %v274_v63, %v192_v7  ;;  %v74_v7 = vpop.f32.mrf.mxu0 }
  0xb7   :  { %v132_v15 = vsub.f32 1.5, %v131_v8  ;;  %v169_v16 = vmul.f32 0.5, %v168_v9  ;;  %v205_v17 = vmul.f32 %v276_v3, %v204_v10 }
  0xb8   :  { %v121_v18 = vmul.f32 %v266_v55, %v120_v11  ;;  %v158_v19 = vsub.f32 1.5, %v157_v12  ;;  %v194_v20 = vmul.f32 0.5, %v193_v14 }
  0xb9   :  { %v133_v21 = vmul.f32 %v268_v56, %v132_v15  ;;  %v170_v22 = vsub.f32 1.5, %v169_v16  ;;  %v206_v24 = vmul.f32 0.5, %v205_v17 }
  0xba   :  { %v122_v25 = vmul.f32 %v121_v18, %v356_v49  ;;  %v159_v26 = vmul.f32 %v270_v58, %v158_v19  ;;  %v195_v27 = vsub.f32 1.5, %v194_v20 }
  0xbb   :  { %v134_v28 = vmul.f32 %v133_v21, %v358_v50  ;;  %v171_v29 = vmul.f32 %v272_v60, %v170_v22  ;;  %v207_v30 = vsub.f32 1.5, %v206_v24 }
  0xbc   :  { %v124_v31 = vsel %vm123_vm1, %v356_v49, %v122_v25  ;;  %v160_v32 = vmul.f32 %v159_v26, %v360_v51  ;;  %v196_v33 = vmul.f32 %v274_v63, %v195_v27 }
  0xbd   :  { %v127_v35 = vsel %vm125_vm2, %v126_v0, %v124_v31  ;;  %v136_v36 = vsel %vm135_vm3, %v358_v50, %v134_v28  ;;  %v172_v37 = vmul.f32 %v171_v29, %v362_v52  ;;  %v208_v38 = vmul.f32 %v276_v3, %v207_v30 }
  0xbe   :  { %v139_v39 = vsel %vm137_vm4, %v138_v5, %v136_v36  ;;  %v162_v40 = vsel %vm161_vm5, %v360_v51, %v160_v32  ;;  %v197_v41 = vmul.f32 %v196_v33, %v365_v53 }
  0xbf   :  { %v140_v42 = vadd.f32 %v139_v39, %v127_v35  ;;  %v165_v43 = vsel %vm163_vm6, %v164_v13, %v162_v40  ;;  %v174_v44 = vsel %vm173_vm7, %v362_v52, %v172_v37  ;;  %v209_v45 = vmul.f32 %v208_v38, %v368_v54 }
  0xc0   :  { %v177_v46 = vsel %vm175_vm8, %v176_v23, %v174_v44  ;;  %v199_v47 = vsel %vm198_vm9, %v365_v53, %v197_v41  ;;  %v27_v53 = vpop.permute.xlu1 %26 }
  0xc1   :  { %v141_v49 = vrot.slane %v140_v42, 4  ;;  %v178_v50 = vadd.f32 %v177_v46, %v165_v43  ;;  %v202_v51 = vsel %vm200_vm10, %v201_v34, %v199_v47  ;;  %v211_v55 = vsel %vm210_vm11, %v368_v54, %v209_v45 }
  0xc2   :  { %v214_v56 = vsel %vm212_vm12, %v213_v48, %v211_v55  ;;  %v75_v10 = vadd.f32 %v74_v7, %v27_v53 }
  0xc3   :  { %v142_v57 = vadd.f32 %v141_v49, %v140_v42  ;;  %v179_v58 = vrot.slane %v178_v50, 4  ;;  %v215_v52 = vadd.f32 %v214_v56, %v202_v51 }
  0xc5   :  { %v143_v59 = vrot.slane %v142_v57, 2  ;;  %v180_v60 = vadd.f32 %v179_v58, %v178_v50  ;;  %v216_v61 = vrot.slane %v215_v52, 4 }
  0xc7   :  { %v144_v62 = vadd.f32 %v143_v59, %v142_v57  ;;  %v181_v63 = vrot.slane %v180_v60, 2  ;;  %v217_v0 = vadd.f32 %v216_v61, %v215_v52 }
  0xc9   :  { %v145_v1 = vrot.slane %v144_v62, 1  ;;  %v182_v2 = vadd.f32 %v181_v63, %v180_v60  ;;  %v218_v3 = vrot.slane %v217_v0, 2 }
  0xcb   :  { %v146_v4 = vadd.f32 %v145_v1, %v144_v62  ;;  %v183_v5 = vrot.slane %v182_v2, 1  ;;  %v219_v6 = vadd.f32 %v218_v3, %v217_v0 }
  0xcd   :  { %v147_v8 = vmul.f32 0.0625, %v146_v4  ;;  %v184_v54 = vadd.f32 %v183_v5, %v182_v2  ;;  %v220_v9 = vrot.slane %v219_v6, 1 }
  0xcf   :  { %v148_v11 = vmul.f32 2.0, %v147_v8  ;;  %v185_v12 = vmul.f32 0.0625, %v184_v54  ;;  %v221_v13 = vadd.f32 %v220_v9, %v219_v6 }
  0xd1   :  { %v149_v14 = vadd.f32 %v148_v11, %v75_v10  ;;  %v186_v15 = vadd.f32 %v185_v12, %v75_v10  ;;  %v222_v16 = vmul.f32 0.0625, %v221_v13 }
  0xd3   :  { %150 = vst [vmem:[#allocation2] sm:$0x1] %v149_v14  ;;  %v223_v17 = vmul.f32 0.5, %v222_v16 }
  0xd4   :  { %187 = vst [vmem:[#allocation2 + $0x1] sm:$0x1] %v186_v15 }
  0xd5   :  { %v224_v18 = vadd.f32 %v223_v17, %v75_v10 }
  0xd7   :  { %225 = vst [vmem:[#allocation2 + $0x2] sm:$0x1] %v224_v18 }
  0xd8   :  { %236 = dma.vmem_to_hbm [thread:$0]  %s232_s28, 64, %s234_s4, [#allocation3]  }
  0xd9   :  { %301 = dma.done.wait [#allocation3], 64  }
  0xda   :  { %302 = vsyncadd [#allocation3], 4294967232 }
  0xdb   :  { %241 = vsyncpa [#allocation3], 1 }

</bundles_post_ra>
